<compile_context>
chip_gen: v7x
topology: tpu7x:2x2x1
jax: 0.10.0
libtpu: 0.0.40
codegen_flags: <defaults>
</compile_context>

<pallas_src>
import jax
import jax.numpy as jnp
from jax.experimental import pallas as pl
from jax.experimental.pallas import tpu as pltpu


# --------------------------------------------------------------------------- #
# Kernel
# --------------------------------------------------------------------------- #
def _gate_kernel(xe_ref, xl_ref, w_ref, b_ref, o_ref):
    """One (TM, d1) row-tile of the Gate forward.

    xe_ref: [TM, d1]        entity features  (input dtype, e.g. f32)
    xl_ref: [TM, d2]        literal features (input dtype)
    w_ref : [d1+d2, 2*d1]   packed [[Wg_ent | W1], [Wg_lit | W2]] (bf16, resident)
    b_ref : [1, 2*d1]       packed [bg | gate_bias] (f32, resident)
    o_ref : [TM, d1]
    """
    d1 = o_ref.shape[1]
    xe = xe_ref[...]
    xl = xl_ref[...]

    # In-kernel cast to the MXU compute dtype (bf16); one fused matmul over
    # K = d1 + d2 with f32 accumulation, then f32 bias add.
    cdt = w_ref.dtype
    x = jnp.concatenate([xe.astype(cdt), xl.astype(cdt)], axis=-1)   # [TM, d1+d2]
    y = jnp.dot(x, w_ref[...], preferred_element_type=jnp.float32) + b_ref[...]

    g_embedded = jnp.tanh(y[:, :d1])        # tanh(cat(xe, xl) @ Wg^T + bg)
    gate = jax.nn.sigmoid(y[:, d1:])        # sigmoid(xe@W1^T + xl@W2^T + gate_bias)

    xe32 = xe.astype(jnp.float32)
    # (1 - gate) * xe + gate * g  ==  xe + gate * (g - xe)   (one fewer vmul)
    o_ref[...] = (xe32 + gate * (g_embedded - xe32)).astype(o_ref.dtype)


# --------------------------------------------------------------------------- #
# One-time weight packing (do NOT call per forward step)
# --------------------------------------------------------------------------- #
def pack_gate_params(params, compute_dtype=jnp.bfloat16):
    """Pack PyTorch-layout weights into the kernel's fused layout.

    params: wg:[d1, d1+d2], bg:[d1], w1:[d1, d1], w2:[d1, d2], gate_bias:[d1]
    Returns {"w": [d1+d2, 2*d1] compute_dtype, "b": [1, 2*d1] f32}.
    """
    d1 = params["w1"].shape[0]
    wg_t = params["wg"].T                                             # [d1+d2, d1]
    top = jnp.concatenate([wg_t[:d1, :], params["w1"].T], axis=1)     # [d1, 2*d1]
    bot = jnp.concatenate([wg_t[d1:, :], params["w2"].T], axis=1)     # [d2, 2*d1]
    w = jnp.concatenate([top, bot], axis=0).astype(compute_dtype)     # [d1+d2, 2*d1]
    bias = jnp.concatenate([params["bg"], params["gate_bias"]]
                           )[None, :].astype(jnp.float32)             # [1, 2*d1]
    return {"w": w, "b": bias}


# --------------------------------------------------------------------------- #
# Wrapper
# --------------------------------------------------------------------------- #
def _choose_row_tile(n_rows, tile_m):
    tm = min(tile_m, n_rows)
    # Keep >= 2 row tiles (an even split) so v7x's two TensorCores both get
    # work on the ("parallel",) grid axis; no-op on single-core v5e/v6e.
    if n_rows >= 16 and pl.cdiv(n_rows, tm) < 2:
        tm = min(n_rows, ((pl.cdiv(n_rows, 2) + 7) // 8) * 8)
    return tm


def gate_forward(x_ent, x_lit, packed, *, tile_m=1024, out_dtype=jnp.bfloat16):
    """Pallas Gate forward.  `packed` comes from pack_gate_params (one-time)."""
    N, d1 = x_ent.shape
    d2 = x_lit.shape[1]
    w, bias = packed["w"], packed["b"]
    assert w.shape == (d1 + d2, 2 * d1) and bias.shape == (1, 2 * d1)

    tm = _choose_row_tile(N, tile_m)
    grid = (pl.cdiv(N, tm),)

    # Constant index_map -> single pipeline buffer for resident operands.
    resident = dict(pipeline_mode=pl.Buffered(1))

    return pl.pallas_call(
        _gate_kernel,
        out_shape=jax.ShapeDtypeStruct((N, d1), out_dtype),
        grid_spec=pltpu.PrefetchScalarGridSpec(
            num_scalar_prefetch=0,
            grid=grid,
            in_specs=[
                pl.BlockSpec((tm, d1), lambda i: (i, 0)),                 # x_ent tile
                pl.BlockSpec((tm, d2), lambda i: (i, 0)),                 # x_lit tile
                pl.BlockSpec((d1 + d2, 2 * d1), lambda i: (0, 0), **resident),  # W
                pl.BlockSpec((1, 2 * d1), lambda i: (0, 0), **resident),        # bias
            ],
            out_specs=pl.BlockSpec((tm, d1), lambda i: (i, 0)),
        ),
        compiler_params=pltpu.CompilerParams(
            dimension_semantics=("parallel",),   # shard row tiles across TCs on v7x
        ),
    )(x_ent, x_lit, w, bias)


# --------------------------------------------------------------------------- #
# Params / references
# --------------------------------------------------------------------------- #
def init_gate_params(key, input1_size, input2_size, dtype=jnp.float32):
    """PyTorch-layout params, nn.Linear-style uniform(-1/sqrt(fan_in), ...) init."""
    k_g, k_bg, k_1, k_2 = jax.random.split(key, 4)
    fan_g = input1_size + input2_size
    bound_g = 1.0 / jnp.sqrt(fan_g)
    bound1 = 1.0 / jnp.sqrt(input1_size)
    bound2 = 1.0 / jnp.sqrt(input2_size)
    return {
        "wg": jax.random.uniform(k_g, (input1_size, fan_g), dtype,
                                 minval=-bound_g, maxval=bound_g),
        "bg": jax.random.uniform(k_bg, (input1_size,), dtype,
                                 minval=-bound_g, maxval=bound_g),
        "w1": jax.random.uniform(k_1, (input1_size, input1_size), dtype,
                                 minval=-bound1, maxval=bound1),
        "w2": jax.random.uniform(k_2, (input1_size, input2_size), dtype,
                                 minval=-bound2, maxval=bound2),
        "gate_bias": jnp.zeros((input1_size,), dtype),
    }


def gate_reference(x_ent, x_lit, params):
    """Pure-JAX f32 reference matching the PyTorch forward exactly."""
    x = jnp.concatenate([x_ent, x_lit], axis=-1)
    g_embedded = jnp.tanh(x @ params["wg"].T + params["bg"])
    gate = jax.nn.sigmoid(x_ent @ params["w1"].T + x_lit @ params["w2"].T
                          + params["gate_bias"])
    return (1.0 - gate) * x_ent + gate * g_embedded


def gate_reference_bf16_matmul(x_ent, x_lit, params):
    """Reference with the kernel's mixed precision: bf16 matmul operands,
    f32 bias / activations / blend (blend uses exact f32 x_ent)."""
    q = lambda a: a.astype(jnp.bfloat16).astype(jnp.float32)
    x = jnp.concatenate([q(x_ent), q(x_lit)], axis=-1)
    g_embedded = jnp.tanh(x @ q(params["wg"]).T + params["bg"])
    gate = jax.nn.sigmoid(q(x_ent) @ q(params["w1"]).T + q(x_lit) @ q(params["w2"]).T
                          + params["gate_bias"])
    return (1.0 - gate) * x_ent + gate * g_embedded


# --------------------------------------------------------------------------- #
# Smoke test
# --------------------------------------------------------------------------- #
if __name__ == "__main__":
    key = jax.random.PRNGKey(0)
    k_params, k_ent, k_lit = jax.random.split(key, 3)

    N = 512             # number of nodes (splits into 2 row tiles -> exercises grid)
    input1_size = 128   # entity embedding dim (lane-tile aligned)
    input2_size = 64    # literal embedding dim

    params = init_gate_params(k_params, input1_size, input2_size)
    packed = pack_gate_params(params)            # one-time weight packing
    x_ent = jax.random.normal(k_ent, (N, input1_size), jnp.float32)
    x_lit = jax.random.normal(k_lit, (N, input2_size), jnp.float32)

    # bf16-output fast path (default).
    out = gate_forward(x_ent, x_lit, packed)
    out = jax.block_until_ready(out)
    assert out.shape == (N, input1_size)
    assert out.dtype == jnp.bfloat16
    out32 = out.astype(jnp.float32)

    # Tight check: mixed-precision reference matching the kernel, with slack
    # for bf16 output rounding.
    ref_q = gate_reference_bf16_matmul(x_ent, x_lit, params)
    assert jnp.allclose(out32, ref_q, atol=2e-2, rtol=2e-2), \
        "mismatch vs bf16-matmul reference"

    # Loose sanity check vs the pure-f32 reference (bf16 rounding only).
    ref = gate_reference(x_ent, x_lit, params)
    assert float(jnp.max(jnp.abs(out32 - ref))) < 1e-1, \
        "mismatch vs f32 reference beyond bf16 rounding"

    # f32-output path for strict consumers (only output rounding removed).
    out_f32 = jax.block_until_ready(
        gate_forward(x_ent, x_lit, packed, out_dtype=jnp.float32))
    assert out_f32.dtype == jnp.float32
    assert float(jnp.max(jnp.abs(out_f32 - ref_q))) < 1e-2, \
        "f32-output path mismatch vs bf16-matmul reference"

    print("KERNEL_OK")
</pallas_src>

<mosaic_0001>
module attributes {stable_mosaic.version = 11 : i64} {
  func.func @_gate_kernel(%arg0: i32, %arg1: memref<256x128xf32, #tpu.memory_space<vmem>>, %arg2: memref<256x64xf32, #tpu.memory_space<vmem>>, %arg3: memref<192x256xbf16, #tpu.memory_space<vmem>>, %arg4: memref<1x256xf32, #tpu.memory_space<vmem>>, %arg5: memref<256x128xbf16, #tpu.memory_space<vmem>>) attributes {dimension_semantics = [#tpu.dimension_semantics<parallel>], iteration_bounds = array<i64: 2>, scalar_prefetch = 0 : i64, scratch_operands = 0 : i64, tpu.core_type = #tpu.core_type<tc>, window_params = [{transform_indices = @transform_0, window_bounds = array<i64: 256, 128>}, {transform_indices = @transform_1, window_bounds = array<i64: 256, 64>}, {pipeline_mode = #tpu.pipeline_mode<synchronous>, transform_indices = @transform_2, window_bounds = array<i64: 192, 256>}, {pipeline_mode = #tpu.pipeline_mode<synchronous>, transform_indices = @transform_3, window_bounds = array<i64: 1, 256>}, {transform_indices = @transform_4, window_bounds = array<i64: 256, 128>}]} {
    %c0 = arith.constant 0 : index
    %c0_0 = arith.constant 0 : index
    %0 = vector.load %arg1[%c0, %c0_0] : memref<256x128xf32, #tpu.memory_space<vmem>>, vector<256x128xf32>
    %c0_1 = arith.constant 0 : index
    %c0_2 = arith.constant 0 : index
    %1 = vector.load %arg2[%c0_1, %c0_2] : memref<256x64xf32, #tpu.memory_space<vmem>>, vector<256x64xf32>
    %2 = arith.truncf %0 : vector<256x128xf32> to vector<256x128xbf16>
    %3 = arith.truncf %1 : vector<256x64xf32> to vector<256x64xbf16>
    %4 = tpu.concatenate %2, %3 in 1 : vector<256x128xbf16>, vector<256x64xbf16> -> vector<256x192xbf16>
    %c0_3 = arith.constant 0 : index
    %c0_4 = arith.constant 0 : index
    %5 = vector.load %arg3[%c0_3, %c0_4] : memref<192x256xbf16, #tpu.memory_space<vmem>>, vector<192x256xbf16>
    %cst = arith.constant dense<0.000000e+00> : vector<256x256xf32>
    %6 = tpu.matmul %4, %5, %cst {dimension_numbers = #tpu.dot_dimension_numbers<[1], [0], [0], [1], [0, 0, 1, 1], [], []>} : vector<256x192xbf16>, vector<192x256xbf16>, vector<256x256xf32> -> vector<256x256xf32>
    %c0_5 = arith.constant 0 : index
    %c0_6 = arith.constant 0 : index
    %7 = vector.load %arg4[%c0_5, %c0_6] : memref<1x256xf32, #tpu.memory_space<vmem>>, vector<1x256xf32>
    %8 = vector.broadcast %7 : vector<1x256xf32> to vector<256x256xf32>
    %9 = arith.addf %6, %8 : vector<256x256xf32>
    %10 = vector.extract_strided_slice %9 {offsets = [0, 0], sizes = [256, 128], strides = [1, 1]} : vector<256x256xf32> to vector<256x128xf32>
    %11 = math.tanh %10 : vector<256x128xf32>
    %12 = vector.extract_strided_slice %9 {offsets = [0, 128], sizes = [256, 128], strides = [1, 1]} : vector<256x256xf32> to vector<256x128xf32>
    %13 = arith.negf %12 : vector<256x128xf32>
    %14 = math.exp %13 : vector<256x128xf32>
    %cst_7 = arith.constant 1.000000e+00 : f32
    %15 = vector.broadcast %cst_7 : f32 to vector<256x128xf32>
    %16 = arith.addf %15, %14 : vector<256x128xf32>
    %17 = arith.divf %15, %16 : vector<256x128xf32>
    %18 = arith.subf %11, %0 : vector<256x128xf32>
    %19 = arith.mulf %17, %18 : vector<256x128xf32>
    %20 = arith.addf %0, %19 : vector<256x128xf32>
    %21 = arith.truncf %20 : vector<256x128xf32> to vector<256x128xbf16>
    %c0_8 = arith.constant 0 : index
    %c0_9 = arith.constant 0 : index
    %22 = vector.load %arg5[%c0_8, %c0_9] : memref<256x128xbf16, #tpu.memory_space<vmem>>, vector<256x128xbf16>
    tpu.vector_store %arg5[%c0_8, %c0_9], %21 {strides = array<i32>} : memref<256x128xbf16, #tpu.memory_space<vmem>>, vector<256x128xbf16>,
    return
  }
  func.func @transform_0(%arg0: i32) -> (i32, i32) {
    %c0_i32 = arith.constant 0 : i32
    %c0_i32_0 = arith.constant 0 : i32
    return %arg0, %c0_i32 : i32, i32
  }
  func.func @transform_1(%arg0: i32) -> (i32, i32) {
    %c0_i32 = arith.constant 0 : i32
    %c0_i32_0 = arith.constant 0 : i32
    return %arg0, %c0_i32 : i32, i32
  }
  func.func @transform_2(%arg0: i32) -> (i32, i32) {
    %c0_i32 = arith.constant 0 : i32
    %c0_i32_0 = arith.constant 0 : i32
    %c0_i32_1 = arith.constant 0 : i32
    return %c0_i32, %c0_i32_0 : i32, i32
  }
  func.func @transform_3(%arg0: i32) -> (i32, i32) {
    %c0_i32 = arith.constant 0 : i32
    %c0_i32_0 = arith.constant 0 : i32
    %c0_i32_1 = arith.constant 0 : i32
    return %c0_i32, %c0_i32_0 : i32, i32
  }
  func.func @transform_4(%arg0: i32) -> (i32, i32) {
    %c0_i32 = arith.constant 0 : i32
    %c0_i32_0 = arith.constant 0 : i32
    return %arg0, %c0_i32 : i32, i32
  }
}

</mosaic_0001>

<bundles_post_ra>
// kernel: tpu_custom_call.1
= control target key start
LH: loop header
LB: loop body
LE: loop exit
PB: predicated region body
PF: predicated region fallthrough
CT: control target
= control target key end

     0   :  { %9 = vsyncpa [#allocation3], 0  ;;  %s2596_s0 = inlined_call_operand.vmem [shape: f32[512,128], index: 0, kind: input, shape index: {}]   ;;  %s2597_s1 = inlined_call_operand.vmem [shape: f32[512,64], index: 1, kind: input, shape index: {}]   ;;  %s2598_s2 = inlined_call_operand.vmem [shape: bf16[192,256], index: 2, kind: input, shape index: {}]   ;;  %s2599_s3 = inlined_call_operand.vmem [shape: f32[1,256], index: 3, kind: input, shape index: {}]   ;;  %s2600_s4 = inlined_call_operand.hbm [shape: bf16[512,128], index: 4, kind: output, shape index: {}]  }
   0x1   :  { %11 = vsyncpa [#allocation3 + $0x1], 0  ;;  %s1923_s15 = smov 0   ;;  %s1925_s16 = smov 0  }
   0x2   :  { %s1927_s17 = smov 0   ;;  %s1929_s18 = smov 0  }
   0x3 LB: > { %s1944_s19 = sadd.s32 4294967295, %s1893_s18   ;;  %s1284_s20 = sadd.s32 4294967294, %s1893_s18   ;;  %s1893_s18 = sphi %s1929_s18, %s2624_s18   ;;  %s1889_s17 = sphi %s1927_s17, %s2623_s17   ;;  %s1885_s16 = sphi %s1925_s16, %s2622_s16   ;;  %s1881_s15 = sphi %s1923_s15, %s2621_s15  }
   0x4   : > { %s1948_s21 = sadd.s32 1, %s1893_s18   ;;  %s118_s22 = sadd.s32 1, %s1889_s17 }
   0x5   : > { %s115_s23 = ssub.s32 %s1893_s18, %s1948_s21  ;;  %p128_p0 = scmp.ne.s32.totalorder %s1889_s17, %s1885_s16 }
   0x6   : > { %p116_p1 = scmp.eq.s32.totalorder %s115_s23, 0  ;;  %p129_p2 = scmp.eq.s32.totalorder %s1944_s19, 1 }
   0x7   : > { %p134_p3 = scmp.ne.s32.totalorder %s1885_s16, %s1881_s15  ;;  %p135_p4 = scmp.eq.s32.totalorder %s1284_s20, 1 }
   0x8   : > { %s1959_s24 = scalar_select %p116_p1, %s1889_s17, %s118_s22  }
   0x9   : > { %p1961_p5 = por %p129_p2, %p128_p0  ;;  %p1965_p6 = por %p135_p4, %p134_p3 }
   0xa   : > { %p1287_p7 = scmp.ge.s32.totalorder %s1893_s18, 1  ;;  %p177_p8 = scmp.lt.s32.totalorder %s1893_s18, 3 }
   0xc   : > { %p178_p9 = pnand %p1287_p7, %p177_p8 }
   0xe   : > { %181 = sbr.rel (%p178_p9) target bundleno = 422 (0x1a6), region = 36 }
  0x15   : > { %v1595_v0 = vld [vmem:[%s2598_s2 + $0x4] ss:$8 sps:$4 sm:$0xff]   ;;  %s1289_s29 = sshll.u32 %s1944_s19, 5  ;;  %v1597_v1 = vld [vmem:[%s2598_s2] ss:$8 sps:$4 sm:$0xff]   ;;  %vm474_vm0 = vcmask 523264  }
  0x16   : > { %523 = vmatprep.subr.bf16.mxu0 %v1595_v0  ;;  %1530 = vmatprep.subr.bf16.mxu1 %v1595_v0  ;;  %v1598_v2 = vld [vmem:[%s2598_s2 + $0x14] ss:$8 sps:$4 sm:$0xff]   ;;  %p209_p10 = scmp.lt.s32.totalorder %s1289_s29, 63  ;;  %v1600_v3 = vld [vmem:[%s2598_s2 + $0x10] ss:$8 sps:$4 sm:$0xff]   ;;  %s1434_s20 = sshll.u32 %s1944_s19, 11 }
  0x17   : > { %524 = vmatpush1.bf16.msra.mxu0 %v1597_v1  ;;  %1542 = vmatpush1.bf16.msra.mxu1 %v1597_v1  ;;  %v1601_v4 = vld [vmem:[%s2598_s2 + $0x24] ss:$8 sps:$4 sm:$0xff]   ;;  %v1603_v5 = vld [vmem:[%s2598_s2 + $0x20] ss:$8 sps:$4 sm:$0xff]   ;;  %v1604_v6 = vld [vmem:[%s2598_s2 + $0x34] ss:$8 sps:$4 sm:$0xff]   ;;  %s2547_s30 = scalar_lea.hbm %s2600_s4, %s1434_s20 }
  0x18   : > { %525 = vmatprep.subr.bf16.mxu0 %v1598_v2  ;;  %1531 = vmatprep.subr.bf16.mxu1 %v1598_v2  ;;  %s2626_s29 = smov (!%p209_p10, %s1289_s29), 63  ;;  %v1606_v7 = vld [vmem:[%s2598_s2 + $0x30] ss:$8 sps:$4 sm:$0xff]   ;;  %v1607_v8 = vld [vmem:[%s2598_s2 + $0x44] ss:$8 sps:$4 sm:$0xff]   ;;  %s1895_s6 = smov [#allocation2]  }
  0x19   : > { %s1290_s22 = sshll.u32 %s2626_s29, 3  ;;  %v1609_v9 = vld [vmem:[%s2598_s2 + $0x40] ss:$8 sps:$4 sm:$0xff]   ;;  %v1610_v10 = vld [vmem:[%s2598_s2 + $0x54] ss:$8 sps:$4 sm:$0xff]  }
  0x1a   : > { %s2007_s7 = scalar_lea.vmem %s2597_s1, %s1290_s22  ;;  %v1612_v17 = vld [vmem:[%s2598_s2 + $0x50] ss:$8 sps:$4 sm:$0xff]   ;;  %v1613_v18 = vld [vmem:[%s2598_s2 + $0x64] ss:$8 sps:$4 sm:$0xff]   ;;  %v1615_v19 = vld [vmem:[%s2598_s2 + $0x60] ss:$8 sps:$4 sm:$0xff]   ;;  %s2059_s8 = scalar_lea.vmem %s2596_s0, %s1290_s22 }
  0x1b   : > { %526 = vmatpush1.bf16.msra.mxu0 %v1600_v3  ;;  %1543 = vmatpush1.bf16.msra.mxu1 %v1600_v3  ;;  %v254_v11 = vld [vmem:[%s2007_s7] sm:$0xff]  ;;  %v255_v12 = vld [vmem:[%s2007_s7 + $0x8] sm:$0xff]  ;;  %v1616_v20 = vld [vmem:[%s2598_s2 + $0x74] ss:$8 sps:$4 sm:$0xff]  }
  0x1c   : > { %527 = vmatprep.subr.bf16.mxu0 %v1601_v4  ;;  %1532 = vmatprep.subr.bf16.mxu1 %v1601_v4  ;;  %v270_v13 = vld [vmem:[%s2007_s7 + $0x80] sm:$0xff]  ;;  %v302_v14 = vpack.c.bf16 %v255_v12, %v254_v11  ;;  %v271_v15 = vld [vmem:[%s2007_s7 + $0x88] sm:$0xff]  ;;  %v1618_v21 = vld [vmem:[%s2598_s2 + $0x70] ss:$8 sps:$4 sm:$0xff]  }
  0x1d   : > { %v310_v16 = vpack.c.bf16 %v271_v15, %v270_v13  ;;  %v1619_v22 = vld [vmem:[%s2598_s2 + $0x84] ss:$8 sps:$4 sm:$0xff]   ;;  %v1621_v23 = vld [vmem:[%s2598_s2 + $0x80] ss:$8 sps:$4 sm:$0xff]   ;;  %v1622_v24 = vld [vmem:[%s2598_s2 + $0x94] ss:$8 sps:$4 sm:$0xff]  }
  0x1e   : > { %1317 = vmatprep.mubr.msk.bf16.mxu0 %vm474_vm0, %v302_v14  ;;  %v1624_v25 = vld [vmem:[%s2598_s2 + $0x90] ss:$8 sps:$4 sm:$0xff]   ;;  %v1625_v26 = vld [vmem:[%s2598_s2 + $0xa4] ss:$8 sps:$4 sm:$0xff]   ;;  %v1627_v27 = vld [vmem:[%s2598_s2 + $0xa0] ss:$8 sps:$4 sm:$0xff]  }
  0x1f   : > { %528 = vmatpush1.bf16.msra.mxu0 %v1603_v5  ;;  %1544 = vmatpush1.bf16.msra.mxu1 %v1603_v5  ;;  %v1628_v28 = vld [vmem:[%s2598_s2 + $0xb4] ss:$8 sps:$4 sm:$0xff]   ;;  %v1630_v29 = vld [vmem:[%s2598_s2 + $0xb0] ss:$8 sps:$4 sm:$0xff]   ;;  %v2068_v30 = vld [vmem:[%s2059_s8] sm:$0xff] }
  0x20   : > { %529 = vmatprep.subr.bf16.mxu0 %v1604_v6  ;;  %1533 = vmatprep.subr.bf16.mxu1 %v1604_v6  ;;  %v2071_v31 = vld [vmem:[%s2059_s8 + $0x8] sm:$0xff]  ;;  %v2074_v32 = vld [vmem:[%s2059_s8 + $0x80] sm:$0xff]  ;;  %v256_v34 = vld [vmem:[%s2007_s7 + $0x10] sm:$0xff] }
  0x21   : > { %1325 = vmatprep.mubr.msk.bf16.mxu1 %vm474_vm0, %v310_v16  ;;  %v2077_v33 = vld [vmem:[%s2059_s8 + $0x88] sm:$0xff]  ;;  %v257_v35 = vld [vmem:[%s2007_s7 + $0x18] sm:$0xff]  ;;  %v272_v36 = vld [vmem:[%s2007_s7 + $0x90] sm:$0xff]  ;;  %v286_v38 = vpack.c.bf16 %v2071_v31, %v2068_v30 }
  0x22   : > { %v273_v37 = vld [vmem:[%s2007_s7 + $0x98] sm:$0xff]  ;;  %v294_v39 = vpack.c.bf16 %v2077_v33, %v2074_v32  ;;  %v303_v40 = vpack.c.bf16 %v257_v35, %v256_v34  ;;  %v2088_v42 = vld [vmem:[%s2059_s8 + $0x10] sm:$0xff]  ;;  %v258_v46 = vld [vmem:[%s2007_s7 + $0x20] sm:$0xff] }
  0x23   : > { %530 = vmatpush1.bf16.msra.mxu0 %v1606_v7  ;;  %1545 = vmatpush1.bf16.msra.mxu1 %v1606_v7  ;;  %v311_v41 = vpack.c.bf16 %v273_v37, %v272_v36  ;;  %v2091_v43 = vld [vmem:[%s2059_s8 + $0x18] sm:$0xff]  ;;  %v2096_v44 = vld [vmem:[%s2059_s8 + $0x90] sm:$0xff]  ;;  %v259_v47 = vld [vmem:[%s2007_s7 + $0x28] sm:$0xff] }
  0x24   : > { %531 = vmatprep.subr.bf16.mxu0 %v1607_v8  ;;  %1534 = vmatprep.subr.bf16.mxu1 %v1607_v8  ;;  %v2099_v45 = vld [vmem:[%s2059_s8 + $0x98] sm:$0xff]  ;;  %v274_v48 = vld [vmem:[%s2007_s7 + $0xa0] sm:$0xff]  ;;  %v275_v49 = vld [vmem:[%s2007_s7 + $0xa8] sm:$0xff]  ;;  %v287_v50 = vpack.c.bf16 %v2091_v43, %v2088_v42  ;;  %v304_v52 = vpack.c.bf16 %v259_v47, %v258_v46 }
  0x25   : > { %v295_v51 = vpack.c.bf16 %v2099_v45, %v2096_v44  ;;  %v312_v53 = vpack.c.bf16 %v275_v49, %v274_v48  ;;  %v2110_v54 = vld [vmem:[%s2059_s8 + $0x20] sm:$0xff]  ;;  %v2113_v55 = vld [vmem:[%s2059_s8 + $0x28] sm:$0xff]  ;;  %v260_v58 = vld [vmem:[%s2007_s7 + $0x30] sm:$0xff] }
  0x26   : > { %v2118_v56 = vld [vmem:[%s2059_s8 + $0xa0] sm:$0xff]  ;;  %v2121_v57 = vld [vmem:[%s2059_s8 + $0xa8] sm:$0xff]  ;;  %v261_v59 = vld [vmem:[%s2007_s7 + $0x38] sm:$0xff]  ;;  %v288_v62 = vpack.c.bf16 %v2113_v55, %v2110_v54 }
  0x27   : > { %532 = vmatpush1.bf16.msra.mxu0 %v1609_v9  ;;  %1546 = vmatpush1.bf16.msra.mxu1 %v1609_v9  ;;  %v276_v60 = vld [vmem:[%s2007_s7 + $0xb0] sm:$0xff]  ;;  %v277_v61 = vld [vmem:[%s2007_s7 + $0xb8] sm:$0xff]  ;;  %v296_v63 = vpack.c.bf16 %v2121_v57, %v2118_v56  ;;  %v305_v0 = vpack.c.bf16 %v261_v59, %v260_v58  ;;  %v262_v6 = vld [vmem:[%s2007_s7 + $0x40] sm:$0xff] }
  0x28   : > { %533 = vmatprep.subr.bf16.mxu0 %v1610_v10  ;;  %1535 = vmatprep.subr.bf16.mxu1 %v1610_v10  ;;  %v313_v1 = vpack.c.bf16 %v277_v61, %v276_v60  ;;  %v2132_v2 = vld [vmem:[%s2059_s8 + $0x30] sm:$0xff]  ;;  %v2135_v3 = vld [vmem:[%s2059_s8 + $0x38] sm:$0xff]  ;;  %v263_v7 = vld [vmem:[%s2007_s7 + $0x48] sm:$0xff] }
  0x29   : > { %v2140_v4 = vld [vmem:[%s2059_s8 + $0xb0] sm:$0xff]  ;;  %v2143_v5 = vld [vmem:[%s2059_s8 + $0xb8] sm:$0xff]  ;;  %v278_v8 = vld [vmem:[%s2007_s7 + $0xc0] sm:$0xff]  ;;  %v289_v10 = vpack.c.bf16 %v2135_v3, %v2132_v2  ;;  %v306_v12 = vpack.c.bf16 %v263_v7, %v262_v6 }
  0x2a   : > { %v279_v9 = vld [vmem:[%s2007_s7 + $0xc8] sm:$0xff]  ;;  %v297_v11 = vpack.c.bf16 %v2143_v5, %v2140_v4  ;;  %v2154_v14 = vld [vmem:[%s2059_s8 + $0x40] sm:$0xff] }
  0x2b   : > { %534 = vmatpush1.bf16.msra.mxu0 %v1612_v17  ;;  %1547 = vmatpush1.bf16.msra.mxu1 %v1612_v17  ;;  %v314_v13 = vpack.c.bf16 %v279_v9, %v278_v8  ;;  %v2157_v15 = vld [vmem:[%s2059_s8 + $0x48] sm:$0xff]  ;;  %v2162_v16 = vld [vmem:[%s2059_s8 + $0xc0] sm:$0xff]  ;;  %v344_v8 = vlaneseq }
  0x2c   : > { %535 = vmatprep.subr.bf16.mxu0 %v1613_v18  ;;  %1536 = vmatprep.subr.bf16.mxu1 %v1613_v18  ;;  %v2165_v17 = vld [vmem:[%s2059_s8 + $0xc8] sm:$0xff]  ;;  %v264_v18 = vld [vmem:[%s2007_s7 + $0x50] sm:$0xff]  ;;  %v266_v34 = vld [vmem:[%s2007_s7 + $0x60] sm:$0xff] }
  0x2d   : > { %v267_v35 = vld [vmem:[%s2007_s7 + $0x68] sm:$0xff]  ;;  %v282_v36 = vld [vmem:[%s2007_s7 + $0xe0] sm:$0xff]  ;;  %v345_v9 = vshrl.u32 %v344_v8, 7 }
  0x2e   : > { %v283_v37 = vld [vmem:[%s2007_s7 + $0xe8] sm:$0xff]  ;;  %v2198_v46 = vld [vmem:[%s2059_s8 + $0x60] sm:$0xff] }
  0x2f   : > { %536 = vmatpush1.bf16.msra.mxu0 %v1615_v19  ;;  %1548 = vmatpush1.bf16.msra.mxu1 %v1615_v19  ;;  %v265_v19 = vld [vmem:[%s2007_s7 + $0x58] sm:$0xff]  ;;  %2609 = vst [vmem:[#allocation5_spill] sm:$0xff] %v2198_v46  ;;  %v2201_v47 = vld [vmem:[%s2059_s8 + $0x68] sm:$0xff]  ;;  %v2206_v48 = vld [vmem:[%s2059_s8 + $0xe0] sm:$0xff] }
  0x30   : > { %537 = vmatprep.subr.bf16.mxu0 %v1616_v20  ;;  %1537 = vmatprep.subr.bf16.mxu1 %v1616_v20  ;;  %v280_v20 = vld [vmem:[%s2007_s7 + $0xd0] sm:$0xff]  ;;  %2610 = vst [vmem:[#allocation6_spill] sm:$0xff] %v2201_v47  ;;  %2611 = vst [vmem:[#allocation7_spill] sm:$0xff] %v2206_v48  ;;  %v2209_v49 = vld [vmem:[%s2059_s8 + $0xe8] sm:$0xff]  ;;  %v292_v58 = vpack.c.bf16 %v2201_v47, %v2198_v46 }
  0x31   : > { %2612 = vst [vmem:[#allocation8_spill] sm:$0xff] %v2209_v49  ;;  %v300_v59 = vpack.c.bf16 %v2209_v49, %v2206_v48 }
  0x33   : > { %538 = vmatpush1.bf16.msra.mxu0 %v1618_v21  ;;  %1549 = vmatpush1.bf16.msra.mxu1 %v1618_v21  ;;  %v281_v21 = vld [vmem:[%s2007_s7 + $0xd8] sm:$0xff] }
  0x34   : > { %539 = vmatprep.subr.bf16.mxu0 %v1619_v22  ;;  %1538 = vmatprep.subr.bf16.mxu1 %v1619_v22  ;;  %v290_v22 = vpack.c.bf16 %v2157_v15, %v2154_v14 }
  0x37   : > { %540 = vmatpush1.bf16.msra.mxu0 %v1621_v23  ;;  %1550 = vmatpush1.bf16.msra.mxu1 %v1621_v23  ;;  %v298_v23 = vpack.c.bf16 %v2165_v17, %v2162_v16 }
  0x38   : > { %541 = vmatprep.subr.bf16.mxu0 %v1622_v24  ;;  %1539 = vmatprep.subr.bf16.mxu1 %v1622_v24  ;;  %v307_v24 = vpack.c.bf16 %v265_v19, %v264_v18 }
  0x3b   : > { %542 = vmatpush1.bf16.msra.mxu0 %v1624_v25  ;;  %1551 = vmatpush1.bf16.msra.mxu1 %v1624_v25  ;;  %v315_v25 = vpack.c.bf16 %v281_v21, %v280_v20 }
  0x3c   : > { %543 = vmatprep.subr.bf16.mxu0 %v1625_v26  ;;  %1540 = vmatprep.subr.bf16.mxu1 %v1625_v26  ;;  %v2176_v26 = vld [vmem:[%s2059_s8 + $0x50] sm:$0xff] }
  0x3f   : > { %544 = vmatpush1.bf16.msra.mxu0 %v1627_v27  ;;  %1552 = vmatpush1.bf16.msra.mxu1 %v1627_v27  ;;  %v2179_v27 = vld [vmem:[%s2059_s8 + $0x58] sm:$0xff] }
  0x40   : > { %545 = vmatprep.subr.bf16.mxu0 %v1628_v28  ;;  %1541 = vmatprep.subr.bf16.mxu1 %v1628_v28  ;;  %v2184_v28 = vld [vmem:[%s2059_s8 + $0xd0] sm:$0xff] }
  0x43   : > { %546 = vmatpush1.bf16.msra.mxu0 %v1630_v29  ;;  %1553 = vmatpush1.bf16.msra.mxu1 %v1630_v29  ;;  %v2187_v29 = vld [vmem:[%s2059_s8 + $0xd8] sm:$0xff] }
  0x46   : > { %556 = vmatmul.mubr.bf16.vlgmr.msra.gmra.mrb[0].mxu0 %v286_v38  ;;  %636 = vmatmul.mubr.bf16.vlgmr.msra.gmra.mrb[0].mxu1 %v294_v39  ;;  %v291_v38 = vpack.c.bf16 %v2179_v27, %v2176_v26  ;;  %v299_v39 = vpack.c.bf16 %v2187_v29, %v2184_v28 }
  0x47   : > { %1318 = vmatprep.mubr.msk.bf16.mxu0 %vm474_vm0, %v303_v40  ;;  %1326 = vmatprep.mubr.msk.bf16.mxu1 %vm474_vm0, %v311_v41  ;;  %v308_v40 = vpack.c.bf16 %v267_v35, %v266_v34  ;;  %v316_v41 = vpack.c.bf16 %v283_v37, %v282_v36 }
  0x4e   : > { %566 = vmatmul.mubr.bf16.gmra.mrb[4].mxu0 %v287_v50  ;;  %646 = vmatmul.mubr.bf16.gmra.mrb[4].mxu1 %v295_v51  ;;  %v268_v50 = vld [vmem:[%s2007_s7 + $0x70] sm:$0xff]  ;;  %v269_v51 = vld [vmem:[%s2007_s7 + $0x78] sm:$0xff] }
  0x4f   : > { %1319 = vmatprep.mubr.msk.bf16.mxu0 %vm474_vm0, %v304_v52  ;;  %1327 = vmatprep.mubr.msk.bf16.mxu1 %vm474_vm0, %v312_v53  ;;  %v284_v52 = vld [vmem:[%s2007_s7 + $0xf0] sm:$0xff]  ;;  %v285_v53 = vld [vmem:[%s2007_s7 + $0xf8] sm:$0xff]  ;;  %v309_v60 = vpack.c.bf16 %v269_v51, %v268_v50  ;;  %s205_s7 = sand.u32 1, %s1885_s16  }
  0x50   : > { %v317_v61 = vpack.c.bf16 %v285_v53, %v284_v52  ;;  %s2303_s13 = sshll.u32 %s205_s7, 7  ;;  %s2555_s19 = scalar_lea.sflag [#allocation3], %s205_s7 }
  0x51   : > { %s2332_s14 = scalar_lea.vmem [#allocation2], %s2303_s13 }
  0x52   : > { %s1210_s23 = sshll.u32 %s2332_s14, 4  ;;  %s2549_s23 = int_to_ptr.vmem [resolvable:$true] %s1210_s23 }
  0x53   : > { %s1831_s5 = scalar_lea.vmem %s2549_s23, 2048 }
  0x54   : > { %p1832_p11 = scmp.ne.s32.totalorder %s2549_s23, %s1831_s5 }
  0x56   : > { %576 = vmatmul.mubr.bf16.gmra.mrb[8].mxu0 %v288_v62  ;;  %656 = vmatmul.mubr.bf16.gmra.mrb[8].mxu1 %v296_v63  ;;  %v2220_v62 = vld [vmem:[%s2059_s8 + $0x70] sm:$0xff]  ;;  %v237_v63 = vld [vmem:[%s2059_s8 + $0x78] sm:$0xff]  ;;  %p1833_p12 = pnand %p1832_p11, %p1961_p5 }
  0x57   : > { %1320 = vmatprep.mubr.msk.bf16.mxu0 %vm474_vm0, %v305_v0  ;;  %1328 = vmatprep.mubr.msk.bf16.mxu1 %vm474_vm0, %v313_v1  ;;  %2613 = vst [vmem:[#allocation9_spill] sm:$0xff] %v2220_v62  ;;  %v2226_v0 = vld [vmem:[%s2059_s8 + $0xf0] sm:$0xff]  ;;  %v253_v1 = vld [vmem:[%s2059_s8 + $0xf8] sm:$0xff]  ;;  %v293_v6 = vpack.c.bf16 %v237_v63, %v2220_v62 }
  0x58   : > { %2614 = vst [vmem:[#allocation10_spill] sm:$0xff] %v2226_v0  ;;  %v301_v7 = vpack.c.bf16 %v253_v1, %v2226_v0  ;;  %p1834_p13 = pneg %p1833_p12 }
  0x5e   : > { %586 = vmatmul.mubr.bf16.gmra.mrb[12].mxu0 %v289_v10  ;;  %666 = vmatmul.mubr.bf16.gmra.mrb[12].mxu1 %v297_v11  ;;  %v346_v10 = vsub.s32 0, %v345_v9  ;;  %v342_v11 = vld [vmem:[%s2599_s3] sm:$0x3] }
  0x5f   : > { %1321 = vmatprep.mubr.msk.bf16.mxu0 %vm474_vm0, %v306_v12  ;;  %1329 = vmatprep.mubr.msk.bf16.mxu1 %vm474_vm0, %v314_v13  ;;  %v350_v12 = vsub.s32 1, %v345_v9 }
  0x60   : > { %v2234_v13 = vrot.slane %v342_v11, %v346_v10 }
  0x61   : > { %v2236_v18 = vrot.slane %v342_v11, %v350_v12 }
  0x66   : > { %596 = vmatmul.mubr.bf16.gmra.mrb[16].mxu0 %v290_v22  ;;  %676 = vmatmul.mubr.bf16.gmra.mrb[16].mxu1 %v298_v23 }
  0x67   : > { %1322 = vmatprep.mubr.msk.bf16.mxu0 %vm474_vm0, %v307_v24  ;;  %1330 = vmatprep.mubr.msk.bf16.mxu1 %vm474_vm0, %v315_v25 }
  0x6e   : > { %606 = vmatmul.mubr.bf16.gmra.mrb[20].mxu0 %v291_v38  ;;  %686 = vmatmul.mubr.bf16.gmra.mrb[20].mxu1 %v299_v39 }
  0x6f   : > { %1323 = vmatprep.mubr.msk.bf16.mxu0 %vm474_vm0, %v308_v40  ;;  %1331 = vmatprep.mubr.msk.bf16.mxu1 %vm474_vm0, %v316_v41 }
  0x76   : > { %616 = vmatmul.mubr.bf16.gmra.mrb[24].mxu0 %v292_v58  ;;  %696 = vmatmul.mubr.bf16.gmra.mrb[24].mxu1 %v300_v59 }
  0x77   : > { %1324 = vmatprep.mubr.msk.bf16.mxu0 %vm474_vm0, %v309_v60  ;;  %1332 = vmatprep.mubr.msk.bf16.mxu1 %vm474_vm0, %v317_v61 }
  0x7e   : > { %626 = vmatmul.mubr.bf16.gmra.mrb[28].mxu0 %v293_v6  ;;  %706 = vmatmul.mubr.bf16.gmra.mrb[28].mxu1 %v301_v7 }
 0x119   : > { %v557_v19 = vpop.f32.mrb[0].mxu0  ;;  %v637_v20 = vpop.f32.mrb[0].mxu1 }
 0x11a   : > { %v558_v21 = vadd.f32 %v557_v19, %v2234_v13  ;;  %v638_v22 = vadd.f32 %v637_v20, %v2234_v13  ;;  %v559_v23 = vpop.f32.mrb[1].mxu0  ;;  %v639_v24 = vpop.f32.mrb[1].mxu1 }
 0x11b   : > { %v560_v25 = vadd.f32 %v559_v23, %v2236_v18  ;;  %v640_v34 = vadd.f32 %v639_v24, %v2236_v18  ;;  %v561_v35 = vpop.f32.mrb[2].mxu0  ;;  %v641_v36 = vpop.f32.mrb[2].mxu1 }
 0x11c   : > { %1631 = vtanh.f32 %v558_v21  ;;  %v562_v37 = vadd.f32 %v561_v35, %v2234_v13  ;;  %v642_v38 = vadd.f32 %v641_v36, %v2234_v13  ;;  %v563_v39 = vpop.f32.mrb[3].mxu0  ;;  %v643_v40 = vpop.f32.mrb[3].mxu1 }
 0x11d   : > { %1633 = vtanh.f32 %v638_v22  ;;  %v1333_v41 = vmul.f32 -1.442695, %v560_v25  ;;  %v1349_v50 = vmul.f32 -1.442695, %v640_v34  ;;  %v564_v51 = vadd.f32 %v563_v39, %v2236_v18 }
 0x11e   : > { %1635 = vtanh.f32 %v562_v37  ;;  %v644_v52 = vadd.f32 %v643_v40, %v2236_v18 }
 0x11f   : > { %1637 = vpow2.f32 %v1333_v41  ;;  %v1334_v53 = vmul.f32 -1.442695, %v564_v51 }
 0x120   : > { %1639 = vpow2.f32 %v1349_v50  ;;  %v1350_v58 = vmul.f32 -1.442695, %v644_v52 }
 0x121   : > { %1641 = vtanh.f32 %v642_v38  ;;  %v567_v59 = vpop.f32.mrb[4].mxu0  ;;  %v647_v60 = vpop.f32.mrb[4].mxu1 }
 0x122   : > { %1643 = vpow2.f32 %v1334_v53  ;;  %v568_v61 = vadd.f32 %v567_v59, %v2234_v13  ;;  %v648_v63 = vadd.f32 %v647_v60, %v2234_v13  ;;  %v569_v1 = vpop.f32.mrb[5].mxu0  ;;  %v649_v6 = vpop.f32.mrb[5].mxu1 }
 0x123   : > { %1645 = vpow2.f32 %v1350_v58  ;;  %v570_v7 = vadd.f32 %v569_v1, %v2236_v18  ;;  %v650_v8 = vadd.f32 %v649_v6, %v2236_v18  ;;  %v571_v9 = vpop.f32.mrb[6].mxu0  ;;  %v651_v10 = vpop.f32.mrb[6].mxu1 }
 0x124   : > { %1647 = vtanh.f32 %v568_v61  ;;  %v573_v11 = vpop.f32.mrb[7].mxu0  ;;  %v653_v12 = vpop.f32.mrb[7].mxu1  ;;  %v572_v21 = vadd.f32 %v571_v9, %v2234_v13  ;;  %v652_v50 = vadd.f32 %v651_v10, %v2234_v13 }
 0x125   : > { %v1335_v19 = vmul.f32 -1.442695, %v570_v7  ;;  %v1351_v20 = vmul.f32 -1.442695, %v650_v8  ;;  %v574_v22 = vadd.f32 %v573_v11, %v2236_v18  ;;  %1649 = vtanh.f32 %v648_v63 }
 0x126   : > { %v2252_v23 = vpop.eup %1631  ;;  %v654_v24 = vadd.f32 %v653_v12, %v2236_v18 }
 0x127   : > { %v2255_v25 = vpop.eup %1633  ;;  %1651 = vpow2.f32 %v1335_v19  ;;  %v1336_v34 = vmul.f32 -1.442695, %v574_v22 }
 0x128   : > { %v2257_v35 = vpop.eup %1635  ;;  %1653 = vpow2.f32 %v1351_v20  ;;  %v1352_v36 = vmul.f32 -1.442695, %v654_v24 }
 0x129   : > { %v1638_v37 = vpop.eup %1637  ;;  %1655 = vtanh.f32 %v572_v21  ;;  %v577_v38 = vpop.f32.mrb[8].mxu0 }
 0x12a   : > { %v657_v39 = vpop.f32.mrb[8].mxu1  ;;  %v1640_v40 = vpop.eup %1639  ;;  %v844_v41 = vadd.f32 1.0, %v1638_v37  ;;  %1657 = vpow2.f32 %v1336_v34  ;;  %v578_v10 = vadd.f32 %v577_v38, %v2234_v13 }
 0x12b   : > { %v579_v51 = vpop.f32.mrb[9].mxu0  ;;  %v659_v52 = vpop.f32.mrb[9].mxu1  ;;  %v860_v58 = vadd.f32 1.0, %v1640_v40  ;;  %1659 = vpow2.f32 %v1352_v36  ;;  %v658_v38 = vadd.f32 %v657_v39, %v2234_v13 }
 0x12c   : > { %v2260_v53 = vpop.eup %1641  ;;  %v580_v59 = vadd.f32 %v579_v51, %v2236_v18  ;;  %v660_v60 = vadd.f32 %v659_v52, %v2236_v18  ;;  %v581_v61 = vpop.f32.mrb[10].mxu0  ;;  %1661 = vrcp.f32 %v844_v41 }
 0x12d   : > { %v661_v63 = vpop.f32.mrb[10].mxu1  ;;  %v1644_v1 = vpop.eup %1643  ;;  %1663 = vrcp.f32 %v860_v58 }
 0x12e   : > { %v583_v6 = vpop.f32.mrb[11].mxu0  ;;  %v663_v7 = vpop.f32.mrb[11].mxu1  ;;  %v845_v9 = vadd.f32 1.0, %v1644_v1  ;;  %1665 = vtanh.f32 %v652_v50  ;;  %v1337_v19 = vmul.f32 -1.442695, %v580_v59 }
 0x12f   : > { %v1646_v8 = vpop.eup %1645  ;;  %v1353_v20 = vmul.f32 -1.442695, %v660_v60  ;;  %v584_v40 = vadd.f32 %v583_v6, %v2236_v18  ;;  %v664_v58 = vadd.f32 %v663_v7, %v2236_v18  ;;  %v582_v7 = vadd.f32 %v581_v61, %v2234_v13 }
 0x130   : > { %v2265_v11 = vpop.eup %1647  ;;  %v861_v12 = vadd.f32 1.0, %v1646_v8  ;;  %1667 = vrcp.f32 %v845_v9  ;;  %v940_v8 = vsub.f32 %v2252_v23, %v2068_v30  ;;  %v941_v61 = vsub.f32 %v2257_v35, %v2071_v31 }
 0x131   : > { %v2267_v21 = vpop.eup %1649  ;;  %v2269_v24 = vpop.f32.mrb[12].mxu0  ;;  %v942_v35 = vsub.f32 %v2265_v11, %v2088_v42 }
 0x132   : > { %1669 = vrcp.f32 %v861_v12  ;;  %v1652_v22 = vpop.eup %1651  ;;  %v2271_v34 = vpop.f32.mrb[12].mxu1 }
 0x133   : > { %1671 = vtanh.f32 %v578_v10  ;;  %v1654_v36 = vpop.eup %1653  ;;  %v846_v37 = vadd.f32 1.0, %v1652_v22  ;;  %v589_v41 = vpop.f32.mrb[13].mxu0  ;;  %v956_v10 = vsub.f32 %v2255_v25, %v2074_v32  ;;  %v1338_v22 = vmul.f32 -1.442695, %v584_v40 }
 0x134   : > { %1673 = vpow2.f32 %v1337_v19  ;;  %v669_v50 = vpop.f32.mrb[13].mxu1  ;;  %v2275_v51 = vpop.eup %1655  ;;  %v862_v52 = vadd.f32 1.0, %v1654_v36  ;;  %v590_v36 = vadd.f32 %v589_v41, %v2236_v18  ;;  %v662_v40 = vadd.f32 %v661_v63, %v2234_v13 }
 0x135   : > { %1675 = vpow2.f32 %v1353_v20  ;;  %v2278_v59 = vpop.f32.mrb[14].mxu0  ;;  %v2280_v60 = vpop.f32.mrb[14].mxu1  ;;  %v670_v62 = vadd.f32 %v669_v50, %v2236_v18  ;;  %v958_v63 = vsub.f32 %v2267_v21, %v2096_v44  ;;  %v668_v48 = vadd.f32 %v2271_v34, %v2234_v13 }
 0x136   : > { %v1658_v1 = vpop.eup %1657  ;;  %1677 = vrcp.f32 %v846_v37  ;;  %v593_v39 = vpop.f32.mrb[15].mxu0  ;;  %v1354_v37 = vmul.f32 -1.442695, %v664_v58  ;;  %v1339_v50 = vmul.f32 -1.442695, %v590_v36 }
 0x137   : > { %v673_v6 = vpop.f32.mrb[15].mxu1  ;;  %v1660_v9 = vpop.eup %1659  ;;  %1679 = vrcp.f32 %v862_v52  ;;  %v847_v12 = vadd.f32 1.0, %v1658_v1 }
 0x138   : > { %v1662_v19 = vpop.eup %1661  ;;  %v863_v20 = vadd.f32 1.0, %v1660_v9  ;;  %1681 = vtanh.f32 %v658_v38  ;;  %v957_v38 = vsub.f32 %v2260_v53, %v2077_v33  ;;  %v674_v36 = vadd.f32 %v673_v6, %v2236_v18 }
 0x139   : > { %v1664_v0 = vpop.eup %1663  ;;  %v972_v23 = vmul.f32 %v1662_v19, %v940_v8  ;;  %1683 = vrcp.f32 %v847_v12  ;;  %v2297_v41 = vpop.f32.mrb[16].mxu0  ;;  %v1355_v12 = vmul.f32 -1.442695, %v670_v62 }
 0x13a   : > { %v2290_v49 = vpop.eup %1665  ;;  %v988_v25 = vmul.f32 %v1664_v0, %v956_v10  ;;  %1685 = vrcp.f32 %v863_v20  ;;  %v2299_v1 = vpop.f32.mrb[16].mxu1  ;;  %v1356_v34 = vmul.f32 -1.442695, %v674_v36 }
 0x13b   : > { %v1668_v52 = vpop.eup %1667  ;;  %1687 = vtanh.f32 %v582_v7  ;;  %v599_v8 = vpop.f32.mrb[17].mxu0 }
 0x13c   : > { %v1670_v58 = vpop.eup %1669  ;;  %v973_v0 = vmul.f32 %v1668_v52, %v941_v61  ;;  %1689 = vpow2.f32 %v1338_v22  ;;  %v679_v9 = vpop.f32.mrb[17].mxu1  ;;  %v1004_v61 = vadd.f32 %v972_v23, %v2068_v30  ;;  %v594_v22 = vadd.f32 %v593_v39, %v2236_v18 }
 0x13d   : > { %v2307_v53 = vpop.eup %1671  ;;  %v989_v10 = vmul.f32 %v1670_v58, %v957_v38  ;;  %1691 = vpow2.f32 %v1354_v37  ;;  %v2311_v7 = vpop.f32.mrb[18].mxu0  ;;  %v1020_v62 = vadd.f32 %v988_v25, %v2074_v32 }
 0x13e   : > { %v2313_v19 = vpop.f32.mrb[18].mxu1  ;;  %v1674_v20 = vpop.eup %1673  ;;  %v1005_v11 = vadd.f32 %v973_v0, %v2071_v31  ;;  %1693 = vtanh.f32 %v662_v40  ;;  %v588_v31 = vadd.f32 %v2269_v24, %v2234_v13  ;;  %v1340_v24 = vmul.f32 -1.442695, %v594_v22 }
 0x13f   : > { %v2319_v52 = vpop.f32.mrb[19].mxu0  ;;  %v2321_v38 = vpop.f32.mrb[19].mxu1  ;;  %v1021_v37 = vadd.f32 %v989_v10, %v2077_v33  ;;  %v848_v58 = vadd.f32 1.0, %v1674_v20  ;;  %1695 = vpow2.f32 %v1339_v50  ;;  %v943_v33 = vsub.f32 %v2275_v51, %v2091_v43 }
 0x140   : > { %v1676_v21 = vpop.eup %1675  ;;  %v1438_v30 = vpack.c.bf16 %v1005_v11, %v1004_v61  ;;  %v600_v51 = vadd.f32 %v599_v8, %v2236_v18 }
 0x141   : > { %v1678_v47 = vpop.eup %1677  ;;  %v864_v23 = vadd.f32 1.0, %v1676_v21  ;;  %v1478_v6 = vpack.c.bf16 %v1021_v37, %v1020_v62  ;;  %1697 = vrcp.f32 %v848_v58  ;;  %v2340_v40 = vpop.f32.mrb[20].mxu0  ;;  %v680_v62 = vadd.f32 %v679_v9, %v2236_v18 }
 0x142   : > { %v1680_v39 = vpop.eup %1679  ;;  %v974_v0 = vmul.f32 %v1678_v47, %v942_v35  ;;  %1439 = vst [vmem:[%s2332_s14] sm:$0xff] %v1438_v30   ;;  %v959_v47 = vsub.f32 %v2290_v49, %v2099_v45  ;;  %v2342_v35 = vpop.f32.mrb[20].mxu1 }
 0x143   : > { %v2329_v46 = vpop.eup %1681  ;;  %v990_v32 = vmul.f32 %v1680_v39, %v958_v63  ;;  %1699 = vrcp.f32 %v864_v23  ;;  %1522 = vst [vmem:[%s2332_s14 + $0x40] sm:$0xff] %v1478_v6   ;;  %v592_v63 = vadd.f32 %v2278_v59, %v2234_v13  ;;  %v2347_v20 = vpop.f32.mrb[21].mxu0  ;;  %v944_v6 = vsub.f32 %v2307_v53, %v2110_v54 }
 0x144   : > { %v1684_v25 = vpop.eup %1683  ;;  %1701 = vpow2.f32 %v1355_v12  ;;  %v2349_v61 = vpop.f32.mrb[21].mxu1  ;;  %v672_v12 = vadd.f32 %v2280_v60, %v2234_v13  ;;  %v1006_v59 = vadd.f32 %v974_v0, %v2088_v42  ;;  %v598_v0 = vadd.f32 %v2297_v41, %v2234_v13 }
 0x145   : > { %v1686_v50 = vpop.eup %1685  ;;  %v975_v10 = vmul.f32 %v1684_v25, %v943_v33  ;;  %1703 = vtanh.f32 %v588_v31  ;;  %v2355_v22 = vpop.f32.mrb[22].mxu0  ;;  %v1022_v60 = vadd.f32 %v990_v32, %v2096_v44  ;;  %v1357_v32 = vmul.f32 -1.442695, %v680_v62 }
 0x146   : > { %v2351_v11 = vpop.eup %1687  ;;  %v991_v49 = vmul.f32 %v1686_v50, %v959_v47  ;;  %1705 = vtanh.f32 %v668_v48  ;;  %v2357_v36 = vpop.f32.mrb[22].mxu1  ;;  %v604_v33 = vadd.f32 %v2319_v52, %v2236_v18  ;;  %v960_v25 = vsub.f32 %v2329_v46, %v2118_v56 }
 0x147   : > { %v1690_v21 = vpop.eup %1689  ;;  %v1007_v8 = vadd.f32 %v975_v10, %v2091_v43  ;;  %1707 = vpow2.f32 %v1340_v24  ;;  %v2362_v37 = vpop.f32.mrb[23].mxu0  ;;  %v1341_v43 = vmul.f32 -1.442695, %v600_v51  ;;  %v684_v41 = vadd.f32 %v2321_v38, %v2236_v18 }
 0x148   : > { %v2364_v58 = vpop.f32.mrb[23].mxu1  ;;  %v1692_v48 = vpop.eup %1691  ;;  %v1023_v30 = vadd.f32 %v991_v49, %v2099_v45  ;;  %v849_v23 = vadd.f32 1.0, %v1690_v21  ;;  %1709 = vpow2.f32 %v1356_v34  ;;  %v678_v45 = vadd.f32 %v2299_v1, %v2234_v13 }
 0x149   : > { %v1443_v31 = vpack.c.bf16 %v1007_v8, %v1006_v59  ;;  %v865_v42 = vadd.f32 1.0, %v1692_v48  ;;  %1711 = vtanh.f32 %v592_v63  ;;  %v2368_v39 = vpop.eup %1693  ;;  %v617_v47 = vpop.f32.mrb[24].mxu0  ;;  %v2386_v1 = vadd.f32 %v2311_v7, %v2234_v13 }
 0x14a   : > { %v1483_v9 = vpack.c.bf16 %v1023_v30, %v1022_v60  ;;  %1713 = vrcp.f32 %v849_v23  ;;  %v1696_v44 = vpop.eup %1695  ;;  %v697_v34 = vpop.f32.mrb[24].mxu1  ;;  %v2389_v52 = vadd.f32 %v617_v47, %v2234_v13  ;;  %v2393_v38 = vadd.f32 %v2313_v19, %v2234_v13 }
 0x14b   : > { %1515 = vst [vmem:[%s2332_s14 + $0x8] sm:$0xff] %v1443_v31   ;;  %1715 = vrcp.f32 %v865_v42  ;;  %v1698_v24 = vpop.eup %1697  ;;  %v850_v53 = vadd.f32 1.0, %v1696_v44  ;;  %v619_v63 = vpop.f32.mrb[25].mxu0  ;;  %v945_v7 = vsub.f32 %v2351_v11, %v2113_v55  ;;  %v1342_v48 = vmul.f32 -1.442695, %v604_v33 }
 0x14c   : > { %1523 = vst [vmem:[%s2332_s14 + $0x48] sm:$0xff] %v1483_v9   ;;  %1717 = vtanh.f32 %v672_v12  ;;  %v976_v10 = vmul.f32 %v1698_v24, %v944_v6  ;;  %v699_v51 = vpop.f32.mrb[25].mxu1  ;;  %v2396_v12 = vadd.f32 %v697_v34, %v2234_v13  ;;  %v621_v21 = vpop.f32.mrb[26].mxu0  ;;  %v1358_v19 = vmul.f32 -1.442695, %v684_v41 }
 0x14d   : > { %v1700_v50 = vpop.eup %1699  ;;  %1719 = vpow2.f32 %v1341_v43  ;;  %v701_v59 = vpop.f32.mrb[26].mxu1  ;;  %v610_v31 = vadd.f32 %v2347_v20, %v2236_v18  ;;  %v2407_v42 = vadd.f32 %v619_v63, %v2236_v18  ;;  %v690_v11 = vadd.f32 %v2349_v61, %v2236_v18 }
 0x14e   : > { %v1702_v46 = vpop.eup %1701  ;;  %v992_v49 = vmul.f32 %v1700_v50, %v960_v25  ;;  %1721 = vrcp.f32 %v850_v53  ;;  %v623_v60 = vpop.f32.mrb[27].mxu0  ;;  %v2412_v9 = vadd.f32 %v699_v51, %v2236_v18  ;;  %v2415_v6 = vadd.f32 %v621_v21, %v2234_v13 }
 0x14f   : > { %v2398_v8 = vpop.eup %1703  ;;  %v866_v62 = vadd.f32 1.0, %v1702_v46  ;;  %1723 = vpow2.f32 %v1357_v32  ;;  %v703_v30 = vpop.f32.mrb[27].mxu1  ;;  %v2419_v20 = vadd.f32 %v2340_v40, %v2234_v13  ;;  %v2422_v32 = vadd.f32 %v701_v59, %v2234_v13 }
 0x150   : > { %v2402_v23 = vpop.eup %1705  ;;  %1725 = vtanh.f32 %v598_v0  ;;  %v961_v61 = vsub.f32 %v2368_v39, %v2121_v57  ;;  %v2429_v25 = vadd.f32 %v623_v60, %v2236_v18  ;;  %v1343_v40 = vmul.f32 -1.442695, %v610_v31 }
 0x151   : > { %v1708_v43 = vpop.eup %1707  ;;  %1727 = vrcp.f32 %v866_v62  ;;  %v2434_v41 = vadd.f32 %v703_v30, %v2236_v18  ;;  %v627_v47 = vpop.f32.mrb[28].mxu0  ;;  %v1359_v39 = vmul.f32 -1.442695, %v690_v11 }
 0x152   : > { %v1710_v44 = vpop.eup %1709  ;;  %v851_v0 = vadd.f32 1.0, %v1708_v43  ;;  %1729 = vtanh.f32 %v678_v45  ;;  %v946_v45 = vsub.f32 %v2398_v8, %v2132_v2  ;;  %v707_v34 = vpop.f32.mrb[28].mxu1  ;;  %v2437_v51 = vadd.f32 %v627_v47, %v2234_v13 }
 0x153   : > { %v2424_v33 = vpop.eup %1711  ;;  %v867_v24 = vadd.f32 1.0, %v1710_v44  ;;  %1731 = vpow2.f32 %v1342_v48  ;;  %v629_v46 = vpop.f32.mrb[29].mxu0  ;;  %v614_v8 = vadd.f32 %v2362_v37, %v2236_v18  ;;  %v2442_v48 = vadd.f32 %v707_v34, %v2234_v13 }
 0x154   : > { %v1714_v53 = vpop.eup %1713  ;;  %1733 = vrcp.f32 %v851_v0  ;;  %v709_v21 = vpop.f32.mrb[29].mxu1  ;;  %v1024_v43 = vadd.f32 %v992_v49, %v2118_v56  ;;  %v2448_v44 = vadd.f32 %v629_v46, %v2236_v18  ;;  %v962_v34 = vsub.f32 %v2402_v23, %v2140_v4 }
 0x155   : > { %v1716_v50 = vpop.eup %1715  ;;  %v977_v63 = vmul.f32 %v1714_v53, %v945_v7  ;;  %1735 = vrcp.f32 %v867_v24  ;;  %v631_v60 = vpop.f32.mrb[30].mxu0  ;;  %v1008_v7 = vadd.f32 %v976_v10, %v2110_v54  ;;  %v2453_v53 = vadd.f32 %v709_v21, %v2236_v18 }
 0x156   : > { %v1718_v59 = vpop.eup %1717  ;;  %v993_v62 = vmul.f32 %v1716_v50, %v961_v61  ;;  %1737 = vpow2.f32 %v1358_v19  ;;  %v711_v30 = vpop.f32.mrb[30].mxu1  ;;  %v947_v21 = vsub.f32 %v2424_v33, %v2135_v3 }
 0x157   : > { %v1720_v31 = vpop.eup %1719  ;;  %v1009_v11 = vadd.f32 %v977_v63, %v2113_v55  ;;  %v633_v0 = vpop.f32.mrb[31].mxu0  ;;  %1739 = vtanh.f32 %v2386_v1  ;;  %v694_v55 = vadd.f32 %v2364_v58, %v2236_v18  ;;  %v1344_v1 = vmul.f32 -1.442695, %v614_v8 }
 0x158   : > { %v713_v19 = vpop.f32.mrb[31].mxu1  ;;  %v1722_v61 = vpop.eup %1721  ;;  %v1025_v37 = vadd.f32 %v993_v62, %v2121_v57  ;;  %v852_v24 = vadd.f32 1.0, %v1720_v31  ;;  %1741 = vpow2.f32 %v1343_v40  ;;  %v2461_v63 = vadd.f32 %v631_v60, %v2234_v13 }
 0x159   : > { %v1724_v54 = vpop.eup %1723  ;;  %v1448_v56 = vpack.c.bf16 %v1009_v11, %v1008_v7  ;;  %v978_v10 = vmul.f32 %v1722_v61, %v946_v45  ;;  %v2465_v58 = vadd.f32 %v711_v30, %v2234_v13  ;;  %v2468_v40 = vadd.f32 %v633_v0, %v2236_v18 }
 0x15a   : > { %v1726_v49 = vpop.eup %1725  ;;  %v1488_v47 = vpack.c.bf16 %v1025_v37, %v1024_v43  ;;  %1743 = vrcp.f32 %v852_v24  ;;  %v868_v57 = vadd.f32 1.0, %v1724_v54  ;;  %v2474_v62 = vadd.f32 %v713_v19, %v2236_v18 }
 0x15b   : > { %v1728_v50 = vpop.eup %1727  ;;  %1516 = vst [vmem:[%s2332_s14 + $0x10] sm:$0xff] %v1448_v56   ;;  %1745 = vpow2.f32 %v1359_v39  ;;  %v1360_v39 = vmul.f32 -1.442695, %v694_v55  ;;  %v963_v60 = vsub.f32 %v1718_v59, %v2143_v5  ;;  %v688_v30 = vadd.f32 %v2342_v35, %v2234_v13 }
 0x15c   : > { %v1730_v46 = vpop.eup %1729  ;;  %1524 = vst [vmem:[%s2332_s14 + $0x50] sm:$0xff] %v1488_v47   ;;  %v994_v45 = vmul.f32 %v1728_v50, %v962_v34  ;;  %1747 = vrcp.f32 %v868_v57  ;;  %v1345_v18 = vmul.f32 -1.442695, %v2407_v42  ;;  %v1010_v0 = vadd.f32 %v978_v10, %v2132_v2 }
 0x15d   : > { %v1732_v23 = vpop.eup %1731  ;;  %1749 = vtanh.f32 %v2393_v38  ;;  %v612_v38 = vadd.f32 %v2355_v22, %v2234_v13  ;;  %v948_v22 = vsub.f32 %v1726_v49, %v2154_v14  ;;  %v1361_v42 = vmul.f32 -1.442695, %v2412_v9 }
 0x15e   : > { %v1734_v8 = vpop.eup %1733  ;;  %v853_v31 = vadd.f32 1.0, %v1732_v23  ;;  %1751 = vtanh.f32 %v2419_v20  ;;  %v1026_v35 = vadd.f32 %v994_v45, %v2140_v4  ;;  %v964_v10 = vsub.f32 %v1730_v46, %v2162_v16 }
 0x15f   : > { %v1736_v7 = vpop.eup %1735  ;;  %v979_v43 = vmul.f32 %v1734_v8, %v947_v21  ;;  %1753 = vpow2.f32 %v1344_v1  ;;  %v1346_v9 = vmul.f32 -1.442695, %v2429_v25  ;;  %v1362_v46 = vmul.f32 -1.442695, %v2434_v41 }
 0x160   : > { %v1738_v11 = vpop.eup %1737  ;;  %v995_v33 = vmul.f32 %v1736_v7, %v963_v60  ;;  %1755 = vrcp.f32 %v853_v31  ;;  %v1347_v41 = vmul.f32 -1.442695, %v2448_v44 }
 0x161   : > { %v1011_v59 = vadd.f32 %v979_v43, %v2135_v3  ;;  %v869_v19 = vadd.f32 1.0, %v1738_v11  ;;  %1757 = vpow2.f32 %v1360_v39  ;;  %v1740_v20 = vpop.eup %1739 }
 0x162   : > { %v1027_v61 = vadd.f32 %v995_v33, %v2143_v5  ;;  %1759 = vtanh.f32 %v688_v30  ;;  %v1742_v37 = vpop.eup %1741  ;;  %v692_v5 = vadd.f32 %v2357_v36, %v2234_v13  ;;  %v949_v1 = vsub.f32 %v1740_v20, %v2157_v15 }
 0x163   : > { %v1453_v24 = vpack.c.bf16 %v1011_v59, %v1010_v0  ;;  %1761 = vrcp.f32 %v869_v19  ;;  %v854_v3 = vadd.f32 1.0, %v1742_v37  ;;  %v1363_v33 = vmul.f32 -1.442695, %v2453_v53 }
 0x164   : > { %v1744_v2 = vpop.eup %1743  ;;  %v1493_v54 = vpack.c.bf16 %v1027_v61, %v1026_v35  ;;  %1763 = vtanh.f32 %v612_v38  ;;  %v1364_v37 = vmul.f32 -1.442695, %v2474_v62 }
 0x165   : > { %v1746_v56 = vpop.eup %1745  ;;  %1517 = vst [vmem:[%s2332_s14 + $0x18] sm:$0xff] %v1453_v24   ;;  %v980_v4 = vmul.f32 %v1744_v2, %v948_v22  ;;  %1765 = vpow2.f32 %v1345_v18 }
 0x166   : > { %v1748_v55 = vpop.eup %1747  ;;  %1525 = vst [vmem:[%s2332_s14 + $0x58] sm:$0xff] %v1493_v54   ;;  %1767 = vrcp.f32 %v854_v3  ;;  %v870_v49 = vadd.f32 1.0, %v1746_v56 }
 0x167   : > { %v1750_v47 = vpop.eup %1749  ;;  %v996_v34 = vmul.f32 %v1748_v55, %v964_v10  ;;  %1769 = vpow2.f32 %v1361_v42  ;;  %v1012_v60 = vadd.f32 %v980_v4, %v2154_v14 }
 0x168   : > { %v1752_v57 = vpop.eup %1751  ;;  %1771 = vrcp.f32 %v870_v49  ;;  %v965_v39 = vsub.f32 %v1750_v47, %v2165_v17  ;;  %v2615_v47 = vld [vmem:[#allocation5_spill] sm:$0xff] }
 0x169   : > { %v1754_v50 = vpop.eup %1753  ;;  %1773 = vtanh.f32 %v692_v5  ;;  %v950_v11 = vsub.f32 %v1752_v57, %v2176_v26  ;;  %v1028_v14 = vadd.f32 %v996_v34, %v2162_v16  ;;  %v1348_v16 = vmul.f32 -1.442695, %v2468_v40 }
 0x16a   : > { %v1756_v45 = vpop.eup %1755  ;;  %v855_v13 = vadd.f32 1.0, %v1754_v50  ;;  %1775 = vtanh.f32 %v2389_v52  ;;  %v2616_v50 = vld [vmem:[#allocation7_spill] sm:$0xff] }
 0x16b   : > { %v1758_v36 = vpop.eup %1757  ;;  %v981_v23 = vmul.f32 %v1756_v45, %v949_v1  ;;  %1777 = vpow2.f32 %v1346_v9 }
 0x16c   : > { %v1760_v21 = vpop.eup %1759  ;;  %1779 = vrcp.f32 %v855_v13  ;;  %v871_v25 = vadd.f32 1.0, %v1758_v36 }
 0x16d   : > { %v1762_v8 = vpop.eup %1761  ;;  %v1013_v31 = vadd.f32 %v981_v23, %v2157_v15  ;;  %1781 = vpow2.f32 %v1362_v46  ;;  %v966_v0 = vsub.f32 %v1760_v21, %v2184_v28  ;;  %v2617_v23 = vld [vmem:[#allocation6_spill] sm:$0xff] }
 0x16e   : > { %v1764_v30 = vpop.eup %1763  ;;  %v997_v7 = vmul.f32 %v1762_v8, %v965_v39  ;;  %1783 = vrcp.f32 %v871_v25 }
 0x16f   : > { %v1766_v52 = vpop.eup %1765  ;;  %v1458_v43 = vpack.c.bf16 %v1013_v31, %v1012_v60  ;;  %1785 = vtanh.f32 %v2396_v12  ;;  %v2618_v60 = vld [vmem:[#allocation8_spill] sm:$0xff] }
 0x170   : > { %v1768_v38 = vpop.eup %1767  ;;  %v1029_v15 = vadd.f32 %v997_v7, %v2165_v17  ;;  %v856_v18 = vadd.f32 1.0, %v1766_v52  ;;  %1787 = vtanh.f32 %v2415_v6  ;;  %v951_v6 = vsub.f32 %v1764_v30, %v2179_v27 }
 0x171   : > { %v1770_v44 = vpop.eup %1769  ;;  %1518 = vst [vmem:[%s2332_s14 + $0x20] sm:$0xff] %v1458_v43   ;;  %v982_v59 = vmul.f32 %v1768_v38, %v950_v11  ;;  %1789 = vpow2.f32 %v1347_v41  ;;  %v1824_v43 = vld [vmem:[%s2059_s8 + $0x68] sm:$0xff] }
 0x172   : > { %v1772_v19 = vpop.eup %1771  ;;  %v1498_v20 = vpack.c.bf16 %v1029_v15, %v1028_v14  ;;  %1791 = vrcp.f32 %v856_v18  ;;  %v872_v12 = vadd.f32 1.0, %v1770_v44  ;;  %v1825_v14 = vld [vmem:[%s2059_s8 + $0xe0] sm:$0xff]  ;;  %v1826_v18 = vld [vmem:[%s2059_s8 + $0xe8] sm:$0xff] }
 0x173   : > { %v1774_v53 = vpop.eup %1773  ;;  %v998_v35 = vmul.f32 %v1772_v19, %v966_v0  ;;  %1793 = vpow2.f32 %v1363_v33  ;;  %v1014_v10 = vadd.f32 %v982_v59, %v2176_v26  ;;  %v2619_v0 = vld [vmem:[#allocation9_spill] sm:$0xff] }
 0x174   : > { %v1776_v17 = vpop.eup %1775  ;;  %1526 = vst [vmem:[%s2332_s14 + $0x60] sm:$0xff] %v1498_v20   ;;  %1795 = vrcp.f32 %v872_v12  ;;  %v967_v2 = vsub.f32 %v1774_v53, %v2187_v29  ;;  %v2620_v53 = vld [vmem:[#allocation10_spill] sm:$0xff] }
 0x175   : > { %v1778_v61 = vpop.eup %1777  ;;  %1797 = vtanh.f32 %v2422_v32  ;;  %v952_v34 = vsub.f32 %v1776_v17, %v2615_v47 }
 0x176   : > { %v1780_v24 = vpop.eup %1779  ;;  %v857_v22 = vadd.f32 1.0, %v1778_v61  ;;  %1799 = vtanh.f32 %v2437_v51  ;;  %v1030_v51 = vadd.f32 %v998_v35, %v2184_v28 }
 0x177   : > { %v1782_v42 = vpop.eup %1781  ;;  %v983_v54 = vmul.f32 %v1780_v24, %v951_v6  ;;  %1801 = vpow2.f32 %v1348_v16 }
 0x178   : > { %v1784_v40 = vpop.eup %1783  ;;  %1803 = vrcp.f32 %v857_v22  ;;  %v873_v3 = vadd.f32 1.0, %v1782_v42  ;;  %v1828_v42 = vld [vmem:[%s2059_s8 + $0xf8] sm:$0xff] }
 0x179   : > { %v1786_v56 = vpop.eup %1785  ;;  %v1015_v32 = vadd.f32 %v983_v54, %v2179_v27  ;;  %v999_v4 = vmul.f32 %v1784_v40, %v967_v2  ;;  %1805 = vpow2.f32 %v1364_v37  ;;  %v1827_v37 = vld [vmem:[%s2059_s8 + $0x78] sm:$0xff] }
 0x17a   : > { %v1788_v62 = vpop.eup %1787  ;;  %1807 = vrcp.f32 %v873_v3  ;;  %v968_v1 = vsub.f32 %v1786_v56, %v2616_v50  ;;  %v1829_v3 = vld [vmem:[%s2059_s8 + $0x70] sm:$0xff] }
 0x17b   : > { %v1790_v5 = vpop.eup %1789  ;;  %v1463_v55 = vpack.c.bf16 %v1015_v32, %v1014_v10  ;;  %v1031_v49 = vadd.f32 %v999_v4, %v2187_v29  ;;  %1809 = vtanh.f32 %v2442_v48  ;;  %v953_v21 = vsub.f32 %v1788_v62, %v2617_v23  ;;  %v1830_v4 = vld [vmem:[%s2059_s8 + $0xf0] sm:$0xff] }
 0x17c   : > { %v1792_v9 = vpop.eup %1791  ;;  %v858_v57 = vadd.f32 1.0, %v1790_v5 }
 0x17d   : > { %v1794_v26 = vpop.eup %1793  ;;  %1519 = vst [vmem:[%s2332_s14 + $0x28] sm:$0xff] %v1463_v55   ;;  %v1503_v27 = vpack.c.bf16 %v1031_v49, %v1030_v51  ;;  %v984_v46 = vmul.f32 %v1792_v9, %v952_v34 }
 0x17e   : > { %v1796_v45 = vpop.eup %1795  ;;  %1811 = vrcp.f32 %v858_v57  ;;  %v874_v13 = vadd.f32 1.0, %v1794_v26 }
 0x17f   : > { %v1798_v28 = vpop.eup %1797  ;;  %1527 = vst [vmem:[%s2332_s14 + $0x68] sm:$0xff] %v1503_v27   ;;  %v1000_v36 = vmul.f32 %v1796_v45, %v968_v1  ;;  %1813 = vtanh.f32 %v2461_v63  ;;  %v1823_v63 = vld [vmem:[%s2059_s8 + $0x60] sm:$0xff]  ;;  %s1835_s8 = sshll.u32 %s1895_s6, 4  ;;  %s1836_s8 = int_to_ptr.vmem [resolvable:$false] %s1835_s8 }
 0x180   : > { %v1800_v29 = vpop.eup %1799  ;;  %1815 = vrcp.f32 %v874_v13  ;;  %v969_v31 = vsub.f32 %v1798_v28, %v2618_v60  ;;  %v1016_v52 = vadd.f32 %v1823_v63, %v984_v46  ;;  %s1837_s9 = scalar_lea.vmem %s1836_s8, 4096  ;;  %p1838_p0 = scmp.lt.s32.totalorder %s2549_s23, %s1836_s8 }
 0x181   : > { %v1802_v48 = vpop.eup %1801  ;;  %1817 = vtanh.f32 %v2465_v58  ;;  %v1032_v58 = vadd.f32 %v1825_v14, %v1000_v36  ;;  %v954_v59 = vsub.f32 %v1800_v29, %v2619_v0  ;;  %p1839_p1 = scmp.lt.s32.totalorder %s1837_s9, %s1831_s5 }
 0x182   : > { %v1804_v39 = vpop.eup %1803  ;;  %v859_v25 = vadd.f32 1.0, %v1802_v48 }
 0x183   : > { %v1806_v8 = vpop.eup %1805  ;;  %v985_v41 = vmul.f32 %v1804_v39, %v953_v21  ;;  %p1840_p2 = por %p1839_p1, %p1838_p0 }
 0x184   : > { %v1808_v30 = vpop.eup %1807  ;;  %1819 = vrcp.f32 %v859_v25  ;;  %v875_v7 = vadd.f32 1.0, %v1806_v8 }
 0x185   : > { %v1017_v11 = vadd.f32 %v1824_v43, %v985_v41  ;;  %v1001_v33 = vmul.f32 %v1808_v30, %v969_v31  ;;  %v1810_v38 = vpop.eup %1809  ;;  %p1841_p3 = pnand %p1840_p2, %p1834_p13 }
 0x186   : > { %1821 = vrcp.f32 %v875_v7  ;;  %v970_v35 = vsub.f32 %v1810_v38, %v2620_v53 }
 0x187   : > { %v1468_v15 = vpack.c.bf16 %v1017_v11, %v1016_v52  ;;  %v1033_v44 = vadd.f32 %v1826_v18, %v1001_v33 }
 0x188   : > { %v1812_v19 = vpop.eup %1811 }
 0x189   : > { %v1814_v20 = vpop.eup %1813  ;;  %1520 = vst [vmem:[%s2332_s14 + $0x30] sm:$0xff] %v1468_v15   ;;  %v1508_v12 = vpack.c.bf16 %v1033_v44, %v1032_v58  ;;  %v986_v16 = vmul.f32 %v1812_v19, %v954_v59 }
 0x18a   : > { %v1816_v17 = vpop.eup %1815  ;;  %v955_v24 = vsub.f32 %v1814_v20, %v1827_v37 }
 0x18b   : > { %1528 = vst [vmem:[%s2332_s14 + $0x70] sm:$0xff] %v1508_v12   ;;  %v1002_v61 = vmul.f32 %v1816_v17, %v970_v35  ;;  %v1818_v6 = vpop.eup %1817  ;;  %v1018_v56 = vadd.f32 %v1829_v3, %v986_v16 }
 0x18c   : > { %v971_v2 = vsub.f32 %v1818_v6, %v1828_v42 }
 0x18d   : > { %v1034_v62 = vadd.f32 %v1830_v4, %v1002_v61 }
 0x18e   : > { %v1820_v22 = vpop.eup %1819 }
 0x18f   : > { %v987_v54 = vmul.f32 %v1820_v22, %v955_v24 }
 0x190   : > { %v1822_v40 = vpop.eup %1821 }
 0x191   : > { %v1019_v10 = vadd.f32 %v1827_v37, %v987_v54  ;;  %v1003_v32 = vmul.f32 %v1822_v40, %v971_v2 }
 0x193   : > { %v1473_v5 = vpack.c.bf16 %v1019_v10, %v1018_v56  ;;  %v1035_v51 = vadd.f32 %v1828_v42, %v1003_v32 }
 0x195   : > { %1521 = vst [vmem:[%s2332_s14 + $0x38] sm:$0xff] %v1473_v5   ;;  %v1513_v55 = vpack.c.bf16 %v1035_v51, %v1034_v62 }
 0x197   : > { %1529 = vst [vmem:[%s2332_s14 + $0x78] sm:$0xff] %v1513_v55  }
 0x198   : > { %1844 = shalt.err (!%p1841_p3)
}
 0x199   : > { %s1845_s10 = scalar_lea.hbm %s2547_s30, 2048  ;;  %s1849_s29 = scalar_lea.hbm %s2600_s4, 4096 }
 0x19a   : > { %p1846_p4 = scmp.ne.s32.totalorder %s2547_s30, %s1845_s10  ;;  %p1850_p9 = scmp.lt.u32.totalorder %s2547_s30, %s2600_s4 }
 0x19b   : > { %p1851_p10 = scmp.lt.u32.totalorder %s1849_s29, %s1845_s10  ;;  %p1853_p12 = scmp.lt.u32.totalorder %s1845_s10, %s2547_s30 }
 0x19c   : > { %p1847_p7 = pnand %p1846_p4, %p1961_p5 }
 0x19d   : > { %p1852_p11 = por %p1851_p10, %p1850_p9 }
 0x19e   : > { %p1848_p8 = pneg %p1847_p7 }
 0x19f   : > { %p1854_p13 = por %p1853_p12, %p1852_p11 }
 0x1a1   : > { %p1855_p0 = pnand %p1854_p13, %p1848_p8 }
 0x1a3   : > { %1858 = shalt.err (!%p1855_p0)
}
 0x1a4   : > { %s1896_s13 = smov 64   ;;  %s1897_s14 = smov 4  }
 0x1a5   : > { %1554 = dma.vmem_to_hbm [thread:$0]  (%p1961_p5), %s2549_s23, 2048, %s2547_s30, %s2555_s19, %s1896_s13, %s1896_s13, %s1897_s14  }
 0x1a6 PF: > { %p1560_p1 = scmp.ge.s32.totalorder %s1893_s18, 2  ;;  %s1225_s20 = sand.u32 1, %s1881_s15  }
 0x1a7   : > { %s1226_s27 = scalar_lea.sflag [#allocation3], %s1225_s20 }
 0x1a8   : > { %p1557_p2 = pnand %p1560_p1, %p1965_p6 }
 0x1aa   : > { %1876 = dma.done.wait (!%p1557_p2), %s1226_s27, 2048  }
 0x1ab   : > { %1878 = vsyncadd (!%p1557_p2), %s1226_s27, 4294965248  ;;  %p14_p3 = scmp.ge.s32.totalorder %s1948_s21, 4   ;;  %s2621_s15 = smov %s1885_s16 }
 0x1ac   : > { %s2622_s16 = smov %s1889_s17  ;;  %s2623_s17 = smov %s1959_s24 }
 0x1ad   : > { %s2624_s18 = smov %s1948_s21  ;;  %16 = sbr.rel (!%p14_p3) target bundleno = 3 (0x3), region = 74 }
 0x1b4   :  { %1231 = vsyncpa [#allocation3], 1 }
 0x1b5   :  { %1233 = vsyncpa [#allocation3 + $0x1], 1 }

</bundles_post_ra>
